<compile_context>
chip_gen: v7x
topology: tpu7x:2x2x1
jax: 0.10.0
libtpu: 0.0.40
codegen_flags: <defaults>
</compile_context>

<pallas_src>
import math

import jax
import jax.numpy as jnp
import numpy as np
from jax.experimental import pallas as pl
from jax.experimental.pallas import tpu as pltpu  # noqa: F401  (TPU tuning hooks)

# ---- problem sizes (small, consistent with the module) ----
B, S, D = 2, 8, 32          # batch, sequence, embed dim
NUM_HEADS = 4               # module default is 12; pick 4 so head_dim = 8
HEAD_DIM = D // NUM_HEADS
MLP_DIM = 4 * D             # mlp_dim default = 4 * dim  (== 128 here)
LN_EPS = 1e-5               # nn.LayerNorm default eps


def _gelu_tanh(x):
    # tanh-approx GELU: one EUP tanh + a few VPU ops (vs. erf polynomial).
    c = math.sqrt(2.0 / math.pi)
    return 0.5 * x * (1.0 + jnp.tanh(c * (x + 0.044715 * x * x * x)))


def maphead_kernel(x_ref, wvkq_ref, hselT_ref, wo_ref, w1_ref, w2_ref,
                   vecs_ref, out_ref):
    x = x_ref[...]                                                 # (B*S, D)

    # Unpack the small row vectors (one DMA instead of six).
    vecs = vecs_ref[...]                                           # (8, MLP_DIM)
    b1 = vecs[0:1, :]                                              # (1, MLP_DIM)
    bvkq = vecs[1:2, :D + NUM_HEADS]                               # (1, D+H)
    bo = vecs[2:3, :D]
    gamma = vecs[3:4, :D]
    beta = vecs[4:5, :D]
    b2 = vecs[5:6, :D]

    # Fused V-projection + (K-folded) score projection: one MXU round-trip.
    #   r[:, :D]  = x @ wv  + bv          (values)
    #   r[:, D:]  = x @ wkq + bkq         (per-head logits, scale pre-applied)
    r = jnp.dot(x, wvkq_ref[...], preferred_element_type=jnp.float32) + bvkq
    v = r[:, :D]                                                   # (B*S, D)
    scores = r[:, D:D + NUM_HEADS]                                 # (B*S, H)

    # softmax over S independently per (batch, head)
    s3 = scores.reshape(B, S, NUM_HEADS)
    s3 = s3 - jnp.max(s3, axis=1, keepdims=True)
    e3 = jnp.exp(s3)
    denom = jnp.sum(e3, axis=1, keepdims=True)
    p3 = e3 * pl.reciprocal(denom, approx=True)                    # (B, S, H)

    # Broadcast head probabilities across their head_dim lanes (MXU selector;
    # the MXU is otherwise idle here), then reduce over S:
    #   attn[b, d] = sum_s p[b, s, head(d)] * v[b, s, d].
    p_full = jnp.dot(p3.reshape(B * S, NUM_HEADS), hselT_ref[...],
                     preferred_element_type=jnp.float32)           # (B*S, D)
    attn = jnp.sum((p_full * v).reshape(B, S, D), axis=1)          # (B, D)

    attn_out = (jnp.dot(attn, wo_ref[...], preferred_element_type=jnp.float32)
                + bo)                                              # (B, D)

    # LayerNorm over D (biased variance, eps inside rsqrt — like nn.LayerNorm)
    mean = jnp.mean(attn_out, axis=-1, keepdims=True)
    cent = attn_out - mean
    var = jnp.mean(cent * cent, axis=-1, keepdims=True)
    y = cent * jax.lax.rsqrt(var + LN_EPS) * gamma + beta

    # MlpBlock: Linear -> GELU -> Linear, then residual with attn_out
    h1 = jnp.dot(y, w1_ref[...], preferred_element_type=jnp.float32) + b1
    h1 = _gelu_tanh(h1)
    m = jnp.dot(h1, w2_ref[...], preferred_element_type=jnp.float32) + b2

    out_ref[...] = attn_out + m                                    # dense (B, D) store


def map_head(x, params):
    (probe, wq, bq, wk, bk, wv, bv, wo, bo, gamma, beta, w1, b1, w2, b2) = params

    # ---- batch-invariant precompute, hoisted out of the kernel ----
    # Probe query projection + attention scale.
    scale = 1.0 / math.sqrt(HEAD_DIM)
    q = (probe @ wq + bq) * scale                                  # (1, D)

    # (D, H) block-diagonal head selector (hsel[d, h] = 1 iff d // HEAD_DIM == h).
    hsel = jnp.asarray(np.kron(np.eye(NUM_HEADS, dtype=np.float32),
                               np.ones((HEAD_DIM, 1), dtype=np.float32)))
    qsel = hsel * q.T                                              # (D, H)
    hselT = hsel.T                                                 # (H, D)

    # Fold the K projection into the score weight, then fuse with the V
    # projection into a single (D, D+H) matmul operand.
    wkq = wk @ qsel                                                # (D, H)
    bkq = bk @ qsel                                                # (1, H)
    wvkq = jnp.concatenate([wv, wkq], axis=1)                      # (D, D+H)
    bvkq = jnp.concatenate([bv, bkq], axis=1)                      # (1, D+H)

    # Pack all small row vectors into one (8, MLP_DIM) array (rows sliced
    # in-kernel); MLP_DIM == 128 so this is exactly one (8,128) f32 tile.
    def pad_row(vec):
        return jnp.pad(vec, ((0, 0), (0, MLP_DIM - vec.shape[1])))

    vecs = jnp.concatenate(
        [b1, pad_row(bvkq), pad_row(bo), pad_row(gamma), pad_row(beta),
         pad_row(b2), jnp.zeros((2, MLP_DIM), jnp.float32)], axis=0)  # (8, 128)

    x_flat = x.reshape(B * S, D)                                   # (B*S, D)

    # No grid: everything fits comfortably in VMEM, so the whole forward pass
    # is one kernel invocation with full-array blocks (defaults) and a single
    # lane-dense output store.
    out = pl.pallas_call(
        maphead_kernel,
        out_shape=jax.ShapeDtypeStruct((B, D), jnp.float32),
    )(x_flat, wvkq, hselT, wo, w1, w2, vecs)
    return out                                                     # (B, D) == x.squeeze(1)


def init_params(key):
    ks = jax.random.split(key, 16)
    sc = 0.2

    def rnd(k, shape):
        return (sc * jax.random.normal(k, shape)).astype(jnp.float32)

    probe = rnd(ks[0], (1, D))
    wq, bq = rnd(ks[1], (D, D)), rnd(ks[2], (1, D))
    wk, bk = rnd(ks[3], (D, D)), rnd(ks[4], (1, D))
    wv, bv = rnd(ks[5], (D, D)), rnd(ks[6], (1, D))
    wo, bo = rnd(ks[7], (D, D)), rnd(ks[8], (1, D))
    gamma = jnp.ones((1, D), jnp.float32)
    beta = jnp.zeros((1, D), jnp.float32)
    w1, b1 = rnd(ks[9], (D, MLP_DIM)), rnd(ks[10], (1, MLP_DIM))
    w2, b2 = rnd(ks[11], (MLP_DIM, D)), rnd(ks[12], (1, D))
    return (probe, wq, bq, wk, bk, wv, bv, wo, bo, gamma, beta, w1, b1, w2, b2)


def reference(x, params):
    (probe, wq, bq, wk, bk, wv, bv, wo, bo, gamma, beta, w1, b1, w2, b2) = params
    q = (probe @ wq + bq)                              # (1, D), shared across batch
    q = jnp.broadcast_to(q[None], (B, 1, D))
    k = x @ wk + bk                                    # (B, S, D)
    v = x @ wv + bv
    qh = q.reshape(B, 1, NUM_HEADS, HEAD_DIM)
    kh = k.reshape(B, S, NUM_HEADS, HEAD_DIM)
    vh = v.reshape(B, S, NUM_HEADS, HEAD_DIM)
    s = jnp.einsum('bqhd,bkhd->bhqk', qh, kh) / math.sqrt(HEAD_DIM)
    p = jax.nn.softmax(s, axis=-1)
    o = jnp.einsum('bhqk,bkhd->bqhd', p, vh).reshape(B, 1, D)
    attn_out = o @ wo + bo
    mean = jnp.mean(attn_out, axis=-1, keepdims=True)
    var = jnp.mean((attn_out - mean) ** 2, axis=-1, keepdims=True)
    y = (attn_out - mean) * jax.lax.rsqrt(var + LN_EPS) * gamma + beta
    h1 = y @ w1 + b1
    h1 = 0.5 * h1 * (1.0 + jax.scipy.special.erf(h1 * (2.0 ** -0.5)))  # exact GELU
    m = h1 @ w2 + b2
    return (attn_out + m)[:, 0, :]


if __name__ == "__main__":
    key = jax.random.PRNGKey(0)
    kx, kp = jax.random.split(key)
    x = jax.random.normal(kx, (B, S, D), jnp.float32)
    params = init_params(kp)

    out = map_head(x, params)
    out = jax.block_until_ready(out)

    ref = reference(x, params)
    np.testing.assert_allclose(np.asarray(out), np.asarray(ref),
                               rtol=2e-2, atol=2e-2)
    print("KERNEL_OK")
</pallas_src>

<mosaic_0001>
module attributes {stable_mosaic.version = 11 : i64} {
  func.func @maphead_kernel(%arg0: memref<16x32xf32, #tpu.memory_space<vmem>>, %arg1: memref<32x36xf32, #tpu.memory_space<vmem>>, %arg2: memref<4x32xf32, #tpu.memory_space<vmem>>, %arg3: memref<32x32xf32, #tpu.memory_space<vmem>>, %arg4: memref<32x128xf32, #tpu.memory_space<vmem>>, %arg5: memref<128x32xf32, #tpu.memory_space<vmem>>, %arg6: memref<8x128xf32, #tpu.memory_space<vmem>>, %arg7: memref<2x32xf32, #tpu.memory_space<vmem>>) attributes {dimension_semantics = [], scalar_prefetch = 0 : i64, scratch_operands = 0 : i64, tpu.core_type = #tpu.core_type<tc>} {
    %c0 = arith.constant 0 : index
    %c0_0 = arith.constant 0 : index
    %0 = vector.load %arg0[%c0, %c0_0] : memref<16x32xf32, #tpu.memory_space<vmem>>, vector<16x32xf32>
    %c0_1 = arith.constant 0 : index
    %c0_2 = arith.constant 0 : index
    %1 = vector.load %arg6[%c0_1, %c0_2] : memref<8x128xf32, #tpu.memory_space<vmem>>, vector<8x128xf32>
    %2 = vector.extract_strided_slice %1 {offsets = [0, 0], sizes = [1, 128], strides = [1, 1]} : vector<8x128xf32> to vector<1x128xf32>
    %3 = vector.extract_strided_slice %1 {offsets = [1, 0], sizes = [1, 36], strides = [1, 1]} : vector<8x128xf32> to vector<1x36xf32>
    %4 = vector.extract_strided_slice %1 {offsets = [2, 0], sizes = [1, 32], strides = [1, 1]} : vector<8x128xf32> to vector<1x32xf32>
    %5 = vector.extract_strided_slice %1 {offsets = [3, 0], sizes = [1, 32], strides = [1, 1]} : vector<8x128xf32> to vector<1x32xf32>
    %6 = vector.extract_strided_slice %1 {offsets = [4, 0], sizes = [1, 32], strides = [1, 1]} : vector<8x128xf32> to vector<1x32xf32>
    %7 = vector.extract_strided_slice %1 {offsets = [5, 0], sizes = [1, 32], strides = [1, 1]} : vector<8x128xf32> to vector<1x32xf32>
    %c0_3 = arith.constant 0 : index
    %c0_4 = arith.constant 0 : index
    %8 = vector.load %arg1[%c0_3, %c0_4] : memref<32x36xf32, #tpu.memory_space<vmem>>, vector<32x36xf32>
    %cst = arith.constant dense<0.000000e+00> : vector<16x36xf32>
    %9 = tpu.matmul %0, %8, %cst {dimension_numbers = #tpu.dot_dimension_numbers<[1], [0], [0], [1], [0, 0, 1, 1], [], []>} : vector<16x32xf32>, vector<32x36xf32>, vector<16x36xf32> -> vector<16x36xf32>
    %10 = vector.broadcast %3 : vector<1x36xf32> to vector<16x36xf32>
    %11 = arith.addf %9, %10 : vector<16x36xf32>
    %12 = vector.extract_strided_slice %11 {offsets = [0, 0], sizes = [16, 32], strides = [1, 1]} : vector<16x36xf32> to vector<16x32xf32>
    %13 = vector.extract_strided_slice %11 {offsets = [0, 32], sizes = [16, 4], strides = [1, 1]} : vector<16x36xf32> to vector<16x4xf32>
    %14 = vector.shape_cast %13 : vector<16x4xf32> to vector<2x8x4xf32>
    %cst_5 = arith.constant dense<0xFF800000> : vector<2x4xf32>
    %15 = vector.multi_reduction <maximumf>, %14, %cst_5 [1] : vector<2x8x4xf32> to vector<2x4xf32>
    %16 = vector.shape_cast %15 : vector<2x4xf32> to vector<2x1x4xf32>
    %17 = vector.broadcast %16 : vector<2x1x4xf32> to vector<2x8x4xf32>
    %18 = arith.subf %14, %17 : vector<2x8x4xf32>
    %19 = math.exp %18 : vector<2x8x4xf32>
    %cst_6 = arith.constant dense<0.000000e+00> : vector<2x4xf32>
    %20 = vector.multi_reduction <add>, %19, %cst_6 [1] : vector<2x8x4xf32> to vector<2x4xf32>
    %21 = vector.shape_cast %20 : vector<2x4xf32> to vector<2x1x4xf32>
    %22 = tpu.reciprocal %21 {approx = true} : vector<2x1x4xf32> -> vector<2x1x4xf32>
    %23 = vector.broadcast %22 : vector<2x1x4xf32> to vector<2x8x4xf32>
    %24 = arith.mulf %19, %23 : vector<2x8x4xf32>
    %25 = vector.shape_cast %24 : vector<2x8x4xf32> to vector<16x4xf32>
    %c0_7 = arith.constant 0 : index
    %c0_8 = arith.constant 0 : index
    %26 = vector.load %arg2[%c0_7, %c0_8] : memref<4x32xf32, #tpu.memory_space<vmem>>, vector<4x32xf32>
    %cst_9 = arith.constant dense<0.000000e+00> : vector<16x32xf32>
    %27 = tpu.matmul %25, %26, %cst_9 {dimension_numbers = #tpu.dot_dimension_numbers<[1], [0], [0], [1], [0, 0, 1, 1], [], []>} : vector<16x4xf32>, vector<4x32xf32>, vector<16x32xf32> -> vector<16x32xf32>
    %28 = arith.mulf %27, %12 : vector<16x32xf32>
    %29 = vector.shape_cast %28 : vector<16x32xf32> to vector<2x8x32xf32>
    %cst_10 = arith.constant dense<0.000000e+00> : vector<2x32xf32>
    %30 = vector.multi_reduction <add>, %29, %cst_10 [1] : vector<2x8x32xf32> to vector<2x32xf32>
    %c0_11 = arith.constant 0 : index
    %c0_12 = arith.constant 0 : index
    %31 = vector.load %arg3[%c0_11, %c0_12] : memref<32x32xf32, #tpu.memory_space<vmem>>, vector<32x32xf32>
    %cst_13 = arith.constant dense<0.000000e+00> : vector<2x32xf32>
    %32 = tpu.matmul %30, %31, %cst_13 {dimension_numbers = #tpu.dot_dimension_numbers<[1], [0], [0], [1], [0, 0, 1, 1], [], []>} : vector<2x32xf32>, vector<32x32xf32>, vector<2x32xf32> -> vector<2x32xf32>
    %33 = vector.broadcast %4 : vector<1x32xf32> to vector<2x32xf32>
    %34 = arith.addf %32, %33 : vector<2x32xf32>
    %cst_14 = arith.constant dense<0.000000e+00> : vector<2xf32>
    %35 = vector.multi_reduction <add>, %34, %cst_14 [1] : vector<2x32xf32> to vector<2xf32>
    %36 = vector.shape_cast %35 : vector<2xf32> to vector<2x1xf32>
    %cst_15 = arith.constant 3.200000e+01 : f32
    %37 = vector.broadcast %cst_15 : f32 to vector<2x1xf32>
    %38 = arith.divf %36, %37 : vector<2x1xf32>
    %39 = vector.broadcast %38 : vector<2x1xf32> to vector<2x32xf32>
    %40 = arith.subf %34, %39 : vector<2x32xf32>
    %41 = arith.mulf %40, %40 : vector<2x32xf32>
    %cst_16 = arith.constant dense<0.000000e+00> : vector<2xf32>
    %42 = vector.multi_reduction <add>, %41, %cst_16 [1] : vector<2x32xf32> to vector<2xf32>
    %43 = vector.shape_cast %42 : vector<2xf32> to vector<2x1xf32>
    %cst_17 = arith.constant 3.200000e+01 : f32
    %44 = vector.broadcast %cst_17 : f32 to vector<2x1xf32>
    %45 = arith.divf %43, %44 : vector<2x1xf32>
    %cst_18 = arith.constant 9.99999974E-6 : f32
    %46 = vector.broadcast %cst_18 : f32 to vector<2x1xf32>
    %47 = arith.addf %45, %46 : vector<2x1xf32>
    %48 = math.rsqrt %47 : vector<2x1xf32>
    %49 = vector.broadcast %48 : vector<2x1xf32> to vector<2x32xf32>
    %50 = arith.mulf %40, %49 : vector<2x32xf32>
    %51 = vector.broadcast %5 : vector<1x32xf32> to vector<2x32xf32>
    %52 = arith.mulf %50, %51 : vector<2x32xf32>
    %53 = vector.broadcast %6 : vector<1x32xf32> to vector<2x32xf32>
    %54 = arith.addf %52, %53 : vector<2x32xf32>
    %c0_19 = arith.constant 0 : index
    %c0_20 = arith.constant 0 : index
    %55 = vector.load %arg4[%c0_19, %c0_20] : memref<32x128xf32, #tpu.memory_space<vmem>>, vector<32x128xf32>
    %cst_21 = arith.constant dense<0.000000e+00> : vector<2x128xf32>
    %56 = tpu.matmul %54, %55, %cst_21 {dimension_numbers = #tpu.dot_dimension_numbers<[1], [0], [0], [1], [0, 0, 1, 1], [], []>} : vector<2x32xf32>, vector<32x128xf32>, vector<2x128xf32> -> vector<2x128xf32>
    %57 = vector.broadcast %2 : vector<1x128xf32> to vector<2x128xf32>
    %58 = arith.addf %56, %57 : vector<2x128xf32>
    %cst_22 = arith.constant 5.000000e-01 : f32
    %59 = vector.broadcast %cst_22 : f32 to vector<2x128xf32>
    %60 = arith.mulf %59, %58 : vector<2x128xf32>
    %cst_23 = arith.constant 4.471500e-02 : f32
    %61 = vector.broadcast %cst_23 : f32 to vector<2x128xf32>
    %62 = arith.mulf %61, %58 : vector<2x128xf32>
    %63 = arith.mulf %62, %58 : vector<2x128xf32>
    %64 = arith.mulf %63, %58 : vector<2x128xf32>
    %65 = arith.addf %58, %64 : vector<2x128xf32>
    %cst_24 = arith.constant 0.797884583 : f32
    %66 = vector.broadcast %cst_24 : f32 to vector<2x128xf32>
    %67 = arith.mulf %66, %65 : vector<2x128xf32>
    %68 = math.tanh %67 : vector<2x128xf32>
    %cst_25 = arith.constant 1.000000e+00 : f32
    %69 = vector.broadcast %cst_25 : f32 to vector<2x128xf32>
    %70 = arith.addf %69, %68 : vector<2x128xf32>
    %71 = arith.mulf %60, %70 : vector<2x128xf32>
    %c0_26 = arith.constant 0 : index
    %c0_27 = arith.constant 0 : index
    %72 = vector.load %arg5[%c0_26, %c0_27] : memref<128x32xf32, #tpu.memory_space<vmem>>, vector<128x32xf32>
    %cst_28 = arith.constant dense<0.000000e+00> : vector<2x32xf32>
    %73 = tpu.matmul %71, %72, %cst_28 {dimension_numbers = #tpu.dot_dimension_numbers<[1], [0], [0], [1], [0, 0, 1, 1], [], []>} : vector<2x128xf32>, vector<128x32xf32>, vector<2x32xf32> -> vector<2x32xf32>
    %74 = vector.broadcast %7 : vector<1x32xf32> to vector<2x32xf32>
    %75 = arith.addf %73, %74 : vector<2x32xf32>
    %76 = arith.addf %34, %75 : vector<2x32xf32>
    %c0_29 = arith.constant 0 : index
    %c0_30 = arith.constant 0 : index
    %77 = vector.load %arg7[%c0_29, %c0_30] : memref<2x32xf32, #tpu.memory_space<vmem>>, vector<2x32xf32>
    tpu.vector_store %arg7[%c0_29, %c0_30], %76 {strides = array<i32>} : memref<2x32xf32, #tpu.memory_space<vmem>>, vector<2x32xf32>,
    return
  }
}

</mosaic_0001>

<bundles_post_ra>
// kernel: tpu_custom_call.1
= control target key start
LH: loop header
LB: loop body
LE: loop exit
PB: predicated region body
PF: predicated region fallthrough
CT: control target
= control target key end

     0   :  { %vm38_vm0 = vcmask 261120   ;;  %s984_s0 = inlined_call_operand.vmem [shape: f32[16,32], index: 0, kind: input, shape index: {}]   ;;  %s985_s1 = inlined_call_operand.vmem [shape: f32[32,36], index: 1, kind: input, shape index: {}]   ;;  %s986_s2 = inlined_call_operand.vmem [shape: f32[4,32], index: 2, kind: input, shape index: {}]   ;;  %s987_s3 = inlined_call_operand.vmem [shape: f32[32,32], index: 3, kind: input, shape index: {}]   ;;  %s988_s4 = inlined_call_operand.vmem [shape: f32[32,128], index: 4, kind: input, shape index: {}]   ;;  %s989_s5 = inlined_call_operand.vmem [shape: f32[128,32], index: 5, kind: input, shape index: {}]   ;;  %s990_s6 = inlined_call_operand.vmem [shape: f32[8,128], index: 6, kind: input, shape index: {}]   ;;  %s991_s7 = inlined_call_operand.hbm [shape: f32[2,32], index: 7, kind: output, shape index: {}]  }
   0x1   :  { %v30_v0 = vld [vmem:[%s985_s1] sm:$0xff]  ;;  %v31_v1 = vld [vmem:[%s985_s1 + $0x8] sm:$0xff]  ;;  %v32_v2 = vld [vmem:[%s985_s1 + $0x10] sm:$0xff] }
   0x2   :  { %v687_v3 = vpack.c.bf16 %v31_v1, %v30_v0  ;;  %v33_v4 = vld [vmem:[%s985_s1 + $0x18] sm:$0xff]  ;;  %v27_v5 = vld [vmem:[%s984_s0] sm:$0xff] }
   0x3   :  { %v691_v6 = vpack.c.bf16 %v33_v4, %v32_v2  ;;  %622 = vmatprep.mubr.msk.f32.mxu0 %vm38_vm0, %v27_v5 }
   0x4   :  { %12 = vsyncpa [#allocation3], 0  ;;  %688 = vmatprep.subr.bf16.mxu0 %v687_v3  ;;  %v28_v7 = vld [vmem:[%s984_s0 + $0x8] sm:$0xff]  ;;  %v159_v8 = vld [vmem:[%s986_s2] sm:$0xf]  ;;  %vm171_vm1 = vcmask 1043456   ;;  %v34_v9 = vlaneseq }
   0x5   :  { %690 = vmatpush3.bf16.msra.mxu0 %v687_v3  ;;  %v846_v12 = vld [vmem:[%s990_s6] sm:$0xff]  ;;  %vm120_vm2 = vcmask 294144   ;;  %s772_s0 = smov 96   ;;  %vm166_vm3 = vcmask 31744   ;;  %v267_v59 = vld [vmem:[%s987_s3 + $0x8] sm:$0xff]  ;;  %v773_v61 = vmov 0.0|0.0  }
   0x6   :  { %692 = vmatprep.subr.bf16.mxu0 %v691_v6  ;;  %v840_v10 = vshrl.u32 %v34_v9, 7  ;;  %v266_v58 = vld [vmem:[%s987_s3] sm:$0xff]  ;;  %707 = vmatprep.subr.bf16.mxu1 %v773_v61  ;;  %v268_v62 = vld [vmem:[%s987_s3 + $0x10] sm:$0xff]  ;;  %v269_v63 = vld [vmem:[%s987_s3 + $0x18] sm:$0xff]  ;;  %vm774_vm4 = vmmov 0   ;;  %v775_v1 = vmov 0.0  }
   0x7   :  { %v696_v60 = vpack.c.bf16 %v267_v59, %v266_v58  ;;  %v699_v0 = vpack.c.bf16 %v269_v63, %v268_v62  ;;  %684 = vmatprep.mubr.msk.f32.mxu1 %vm774_vm4, %v775_v1  ;;  %vm276_vm5 = vcmask 1041409   ;;  %vm350_vm6 = vcmask 254976   ;;  %v470_v58 = vld [vmem:[%s989_s5 + $0x28] sm:$0xff]  ;;  %v472_v62 = vld [vmem:[%s989_s5 + $0x38] sm:$0xff] }
   0x8   :  { %v36_v11 = vsub.s32 1, %v840_v10 }
   0x9   :  { %694 = vmatpush3.bf16.msra.mxu0 %v691_v6 }
   0xa   :  { %625 = vmatprep.subr.msk.mxu0 %vm171_vm1, %v159_v8  ;;  %v37_v13 = vrot.slane %v846_v12, %v36_v11 }
   0xc   :  { %623 = vmatmul.mubr.msk.f32.vlgmr.msra.gmra.mrb[0].mxu0 %vm38_vm0, %v28_v7 }
   0xd   :  { %626 = vmatpush3.msk.msra.mxu0 %vm171_vm1, %v159_v8 }
   0xe   :  { %695 = vmatprep.subr.bf16.mxu0 %v773_v61 }
  0xdf   :  { %v624_v14 = vpop.f32.mrb[0].mxu0 }
  0xe0   :  { %v849_v15 = vadd.f32 %v624_v14, %v37_v13  ;;  %v111_v16 = vpop.f32.mrb[1].mxu0 }
  0xe1   :  { %v851_v17 = vadd.f32 %v111_v16, %v37_v13 }
  0xe2   :  { %v128_v18 = vsel %vm120_vm2, %v849_v15, -inf }
  0xe3   :  { %v129_v19 = vrot.slane %v128_v18, 4  ;;  %v121_v20 = vsel %vm120_vm2, %v851_v17, -inf }
  0xe4   :  { %v122_v21 = vrot.slane %v121_v20, 4 }
  0xe5   :  { %v130_v22 = vmax.f32 %v128_v18, %v129_v19 }
  0xe6   :  { %v123_v23 = vmax.f32 %v121_v20, %v122_v21 }
  0xe7   :  { %v131_v24 = vrot.slane %v130_v22, 2 }
  0xe8   :  { %v124_v25 = vrot.slane %v123_v23, 2 }
  0xe9   :  { %v132_v26 = vmax.f32 %v130_v22, %v131_v24 }
  0xea   :  { %v125_v27 = vmax.f32 %v123_v23, %v124_v25 }
  0xeb   :  { %v133_v28 = vrot.slane %v132_v26, 1 }
  0xec   :  { %v126_v29 = vrot.slane %v125_v27, 1 }
  0xed   :  { %v134_v30 = vmax.f32 %v132_v26, %v133_v28 }
  0xee   :  { %v127_v31 = vmax.f32 %v125_v27, %v126_v29 }
  0xef   :  { %v136_v32 = vsub.f32 %v849_v15, %v134_v30 }
  0xf0   :  { %v135_v33 = vsub.f32 %v851_v17, %v127_v31 }
  0xf1   :  { %v139_v34 = vmul.f32 1.442695, %v136_v32 }
  0xf2   :  { %v137_v35 = vmul.f32 1.442695, %v135_v33 }
  0xf3   :  { %736 = vpow2.f32 %v139_v34  ;;  %v375_v34 = vld [vmem:[%s988_s4] sm:$0xff] }
  0xf4   :  { %738 = vpow2.f32 %v137_v35  ;;  %v376_v35 = vld [vmem:[%s988_s4 + $0x8] sm:$0xff] }
  0xfd   :  { %v737_v36 = vpop.eup %736 }
  0xfe   :  { %v739_v37 = vpop.eup %738  ;;  %v148_v38 = vsel %vm120_vm2, %v737_v36, 0.0 }
  0xff   :  { %v149_v39 = vrot.slane %v148_v38, 4  ;;  %v141_v40 = vsel %vm120_vm2, %v739_v37, 0.0 }
 0x100   :  { %v142_v41 = vrot.slane %v141_v40, 4 }
 0x101   :  { %v150_v42 = vadd.f32 %v149_v39, %v148_v38  ;;  %v378_v38 = vld [vmem:[%s988_s4 + $0x18] sm:$0xff] }
 0x102   :  { %v143_v43 = vadd.f32 %v142_v41, %v141_v40  ;;  %v465_v40 = vld [vmem:[%s989_s5] sm:$0xff]  ;;  %v466_v41 = vld [vmem:[%s989_s5 + $0x8] sm:$0xff] }
 0x103   :  { %v151_v44 = vrot.slane %v150_v42, 2 }
 0x104   :  { %v144_v45 = vrot.slane %v143_v43, 2 }
 0x105   :  { %v152_v46 = vadd.f32 %v151_v44, %v150_v42  ;;  %v708_v42 = vpack.c.bf16 %v466_v41, %v465_v40 }
 0x106   :  { %v145_v47 = vadd.f32 %v144_v45, %v143_v43 }
 0x107   :  { %v153_v48 = vrot.slane %v152_v46, 1  ;;  %709 = vmatpush3.bf16.msra.mxu1 %v708_v42 }
 0x108   :  { %v146_v49 = vrot.slane %v145_v47, 1  ;;  %710 = vmatprep.subr.bf16.mxu1 %v773_v61 }
 0x109   :  { %v154_v51 = vadd.f32 %v153_v48, %v152_v46  ;;  %v367_v46 = vsub.s32 3, %v840_v10 }
 0x10a   :  { %v147_v50 = vadd.f32 %v146_v49, %v145_v47  ;;  %v372_v47 = vsub.s32 4, %v840_v10 }
 0x10b   :  { %v368_v48 = vrot.slane %v846_v12, %v367_v46 }
 0x10c   :  { %740 = vrcp.f32 %v147_v50 }
 0x10d   :  { %742 = vrcp.f32 %v154_v51  ;;  %v373_v51 = vrot.slane %v846_v12, %v372_v47 }
 0x116   :  { %v741_v52 = vpop.eup %740 }
 0x117   :  { %v157_v53 = vmul.f32 %v741_v52, %v739_v37  ;;  %v743_v54 = vpop.eup %742  ;;  %v377_v37 = vld [vmem:[%s988_s4 + $0x10] sm:$0xff] }
 0x118   :  { %v158_v55 = vmul.f32 %v743_v54, %v737_v36  ;;  %v702_v36 = vpack.c.bf16 %v376_v35, %v375_v34  ;;  %v705_v39 = vpack.c.bf16 %v378_v38, %v377_v37  ;;  %v467_v54 = vld [vmem:[%s989_s5 + $0x10] sm:$0xff] }
 0x119   :  { %162 = vrot.lane.b32.xlu0 %v157_v53, %s772_s0 }
 0x11d   :  { %164 = vrot.lane.b32.xlu0 %v158_v55, %s772_s0  ;;  %v468_v55 = vld [vmem:[%s989_s5 + $0x18] sm:$0xff] }
 0x18b   :  { %v163_v56 = vpop.permute.xlu0 %162 }
 0x18c   :  { %627 = vmatprep.mubr.msk.f32.mxu0 %vm166_vm3, %v163_v56  ;;  %v711_v56 = vpack.c.bf16 %v468_v55, %v467_v54 }
 0x18e   :  { %712 = vmatpush3.bf16.msra.mxu1 %v711_v56 }
 0x18f   :  { %v165_v57 = vpop.permute.xlu0 %164  ;;  %713 = vmatprep.subr.bf16.mxu1 %v773_v61 }
 0x190   :  { %628 = vmatmul.mubr.msk.f32.vlgmr.msra.gmra.mrb[2].mxu0 %vm166_vm3, %v165_v57  ;;  %v469_v57 = vld [vmem:[%s989_s5 + $0x20] sm:$0xff] }
 0x191   :  { %697 = vmatpush3.bf16.msra.mxu0 %v696_v60  ;;  %638 = vmatprep.mubr.msk.f32.mxu0 %vm774_vm4, %v775_v1  ;;  %v714_v59 = vpack.c.bf16 %v470_v58, %v469_v57  ;;  %v471_v60 = vld [vmem:[%s989_s5 + $0x30] sm:$0xff] }
 0x192   :  { %698 = vmatprep.subr.bf16.mxu0 %v773_v61  ;;  %v717_v63 = vpack.c.bf16 %v472_v62, %v471_v60 }
 0x193   :  { %715 = vmatpush3.bf16.msra.mxu1 %v714_v59 }
 0x194   :  { %716 = vmatprep.subr.bf16.mxu1 %v773_v61 }
 0x195   :  { %700 = vmatpush3.bf16.msra.mxu0 %v699_v0  ;;  %v473_v0 = vld [vmem:[%s989_s5 + $0x40] sm:$0xff] }
 0x196   :  { %701 = vmatprep.subr.bf16.mxu0 %v773_v61 }
 0x197   :  { %718 = vmatpush3.bf16.msra.mxu1 %v717_v63 }
 0x198   :  { %719 = vmatprep.subr.bf16.mxu1 %v773_v61 }
 0x263   :  { %v629_v2 = vpop.f32.mrb[2].mxu0 }
 0x264   :  { %v251_v3 = vmul.f32 %v629_v2, %v849_v15  ;;  %v241_v4 = vpop.f32.mrb[3].mxu0 }
 0x265   :  { %v250_v5 = vmul.f32 %v241_v4, %v851_v17  ;;  %v272_v17 = vsub.s32 2, %v840_v10  ;;  %v476_v4 = vld [vmem:[%s989_s5 + $0x58] sm:$0xff] }
 0x266   :  { %v259_v6 = vsel %vm38_vm0, %v251_v3, 0.0  ;;  %v475_v3 = vld [vmem:[%s989_s5 + $0x50] sm:$0xff] }
 0x267   :  { %v260_v7 = vrot.slane %v259_v6, 4  ;;  %v252_v8 = vsel %vm38_vm0, %v250_v5, 0.0  ;;  %v273_v24 = vrot.slane %v846_v12, %v272_v17  ;;  %v723_v5 = vpack.c.bf16 %v476_v4, %v475_v3 }
 0x268   :  { %v253_v9 = vrot.slane %v252_v8, 4 }
 0x269   :  { %v261_v11 = vadd.f32 %v260_v7, %v259_v6  ;;  %v477_v6 = vld [vmem:[%s989_s5 + $0x60] sm:$0xff]  ;;  %v478_v7 = vld [vmem:[%s989_s5 + $0x68] sm:$0xff] }
 0x26a   :  { %v254_v13 = vadd.f32 %v253_v9, %v252_v8  ;;  %v726_v8 = vpack.c.bf16 %v478_v7, %v477_v6  ;;  %v479_v9 = vld [vmem:[%s989_s5 + $0x70] sm:$0xff] }
 0x26b   :  { %v262_v14 = vrot.slane %v261_v11, 2 }
 0x26c   :  { %v255_v16 = vrot.slane %v254_v13, 2 }
 0x26d   :  { %v263_v18 = vadd.f32 %v262_v14, %v261_v11  ;;  %v480_v11 = vld [vmem:[%s989_s5 + $0x78] sm:$0xff]  ;;  %v381_v14 = vsub.s32 0, %v840_v10 }
 0x26e   :  { %v256_v19 = vadd.f32 %v255_v16, %v254_v13  ;;  %v729_v13 = vpack.c.bf16 %v480_v11, %v479_v9 }
 0x26f   :  { %v264_v20 = vrot.slane %v263_v18, 1  ;;  %v382_v16 = vrot.slane %v846_v12, %v381_v14 }
 0x270   :  { %v257_v21 = vrot.slane %v256_v19, 1 }
 0x271   :  { %v265_v22 = vadd.f32 %v264_v20, %v263_v18 }
 0x272   :  { %v258_v15 = vadd.f32 %v257_v21, %v256_v19 }
 0x274   :  { %v277_v23 = vsel %vm276_vm5, %v265_v22, %v258_v15 }
 0x275   :  { %639 = vmatmul.mubr.msk.f32.vlgmr.msra.gmra.mrb[4].mxu0 %vm38_vm0, %v277_v23 }
 0x276   :  { %649 = vmatprep.mubr.msk.f32.mxu0 %vm774_vm4, %v775_v1  ;;  %703 = vmatpush3.bf16.msra.mxu0 %v702_v36  ;;  %v474_v1 = vld [vmem:[%s989_s5 + $0x48] sm:$0xff]  ;;  %s776_s5 = smov [#allocation2]  }
 0x277   :  { %704 = vmatprep.subr.bf16.mxu0 %v773_v61  ;;  %v720_v2 = vpack.c.bf16 %v474_v1, %v473_v0  ;;  %s563_s9 = sshll.u32 %s776_s5, 4  ;;  %s564_s9 = int_to_ptr.vmem [resolvable:$true] %s563_s9 }
 0x278   :  { %s748_s4 = scalar_lea.vmem %s564_s9, 32  ;;  %p753_p1 = scmp.lt.s32.totalorder %s564_s9, %s564_s9 }
 0x279   :  { %721 = vmatpush3.bf16.msra.mxu1 %v720_v2  ;;  %p749_p0 = scmp.ne.s32.totalorder %s564_s9, %s748_s4  ;;  %p754_p2 = scmp.lt.s32.totalorder %s748_s4, %s748_s4 }
 0x27a   :  { %706 = vmatpush3.bf16.msra.mxu0 %v705_v39  ;;  %722 = vmatprep.subr.bf16.mxu1 %v773_v61 }
 0x27b   :  { %p755_p3 = por %p754_p2, %p753_p1 }
 0x27d   :  { %724 = vmatpush3.bf16.msra.mxu1 %v723_v5  ;;  %p756_p4 = pnand %p755_p3, %p749_p0 }
 0x27e   :  { %725 = vmatprep.subr.bf16.mxu1 %v773_v61 }
 0x281   :  { %727 = vmatpush3.bf16.msra.mxu1 %v726_v8 }
 0x282   :  { %728 = vmatprep.subr.bf16.mxu1 %v773_v61  ;;  %v483_v61 = vsub.s32 5, %v840_v10 }
 0x285   :  { %730 = vmatpush3.bf16.msra.mxu1 %v729_v13 }
 0x348   :  { %v346_v25 = vpop.f32.mrb[4].mxu0 }
 0x349   :  { %v887_v26 = vadd.f32 %v346_v25, %v273_v24  ;;  %v640_v27 = vpop.f32.mrb[5].mxu0 }
 0x34b   :  { %v351_v28 = vsel %vm350_vm6, %v887_v26, 0.0 }
 0x34c   :  { %352 = vadd.xlane.f32.xlu1 %v351_v28 }
 0x3d9   :  { %v353_v29 = vpop.xlane.xlu1 %352 }
 0x3da   :  { %v355_v30 = vmul.f32 0.03125, %v353_v29  ;;  %v484_v29 = vrot.slane %v846_v12, %v483_v61 }
 0x3dc   :  { %v356_v31 = vsub.f32 %v887_v26, %v355_v30 }
 0x3de   :  { %v357_v32 = vmul.f32 %v356_v31, %v356_v31 }
 0x3e0   :  { %v358_v33 = vsel %vm350_vm6, %v357_v32, 0.0 }
 0x3e1   :  { %359 = vadd.xlane.f32.xlu1 %v358_v33 }
 0x46e   :  { %v360_v43 = vpop.xlane.xlu1 %359 }
 0x46f   :  { %v361_v44 = vmul.f32 0.03125, %v360_v43 }
 0x471   :  { %v362_v45 = vadd.f32 1e-05, %v361_v44 }
 0x473   :  { %744 = vrsqrt.f32 %v362_v45 }
 0x47d   :  { %v745_v49 = vpop.eup %744 }
 0x47e   :  { %v364_v50 = vmul.f32 %v745_v49, %v356_v31 }
 0x480   :  { %v369_v52 = vmul.f32 %v368_v48, %v364_v50 }
 0x482   :  { %v374_v53 = vadd.f32 %v373_v51, %v369_v52 }
 0x484   :  { %650 = vmatmul.mubr.msk.f32.vlgmr.msra.gmra.mrb[6].mxu0 %vm38_vm0, %v374_v53 }
 0x557   :  { %v452_v18 = vpop.f32.mrb[6].mxu0 }
 0x558   :  { %v453_v19 = vadd.f32 %v452_v18, %v382_v16  ;;  %v651_v20 = vpop.f32.mrb[7].mxu0 }
 0x55a   :  { %v457_v21 = vmul.f32 0.044715, %v453_v19  ;;  %v456_v25 = vmul.f32 0.5, %v453_v19 }
 0x55c   :  { %v458_v22 = vmul.f32 %v457_v21, %v453_v19 }
 0x55e   :  { %v459_v15 = vmul.f32 %v458_v22, %v453_v19 }
 0x560   :  { %v460_v23 = vadd.f32 %v459_v15, %v453_v19 }
 0x562   :  { %v461_v17 = vmul.f32 0.7978846, %v460_v23 }
 0x564   :  { %746 = vtanh.f32 %v461_v17 }
 0x56e   :  { %v747_v24 = vpop.eup %746 }
 0x56f   :  { %v463_v27 = vadd.f32 1.0, %v747_v24 }
 0x571   :  { %v464_v28 = vmul.f32 %v463_v27, %v456_v25 }
 0x573   :  { %685 = vmatmul.mubr.f32.vlgmr.msra.gmra.mrb[0].mxu1 %v464_v28 }
 0x646   :  { %v551_v30 = vpop.f32.mrb[0].mxu1 }
 0x647   :  { %v552_v31 = vadd.f32 %v551_v30, %v484_v29  ;;  %v686_v32 = vpop.f32.mrb[1].mxu1 }
 0x649   :  { %v555_v33 = vadd.f32 %v552_v31, %v887_v26 }
 0x64b   :  { %556 = vst.msk [vmem:[#allocation2] sm:$0x3] %vm350_vm6, %v555_v33 }
 0x64c   :  { %759 = shalt.err (!%p756_p4)
}
 0x64d   :  { %s760_s12 = scalar_lea.hbm %s991_s7, 32 }
 0x64e   :  { %p761_p5 = scmp.ne.s32.totalorder %s991_s7, %s760_s12  ;;  %p764_p6 = scmp.lt.u32.totalorder %s760_s12, %s991_s7 }
 0x650   :  { %p766_p7 = pnand %p764_p6, %p761_p5 }
 0x652   :  { %769 = shalt.err (!%p766_p7)
}
 0x653   :  { %566 = dma.vmem_to_hbm [thread:$0]  %s564_s9, 32, %s991_s7, [#allocation3]  }
 0x654   :  { %770 = dma.done.wait [#allocation3], 32  }
 0x655   :  { %771 = vsyncadd [#allocation3], 4294967264 }
 0x656   :  { %570 = vsyncpa [#allocation3], 1 }

</bundles_post_ra>
